<compile_context>
chip_gen: v6e
topology: v6e:2x2x1
jax: 0.10.0
libtpu: 0.0.40
codegen_flags: <defaults>
</compile_context>

<pallas_src>
import jax
import jax.numpy as jnp
from jax import lax
from jax.experimental import pallas as pl
from jax.experimental.pallas import tpu as pltpu


# --------------------------------------------------------------------------
# Pallas kernel
# --------------------------------------------------------------------------
def _resized_crop_kernel(wh_ref, wwt_ref, ct_ref, mri_ref,
                         ct_out_ref, mri_out_ref, tmp_ref):
    """out[b] = WH @ img[b] @ WW^T for every slab b in the block, both tensors."""
    wh = wh_ref[...]       # (H_out, H_in) f32 row-interpolation weights
    wwt = wwt_ref[...]     # (W_in, W_out) f32 col-interpolation weights (pre-transposed)
    nb, h, w = ct_ref.shape
    unroll = True if nb <= 8 else 8

    def resize_all(in_ref, out_ref):
        in_dt = in_ref.dtype
        is_float = jnp.issubdtype(in_dt, jnp.floating)
        # Feed the MXU the native float dtype (bf16 stays bf16); only cast the
        # small weight matrix, never the image slab. Integer images -> f32.
        whc = wh if (not is_float or in_dt == jnp.float32) else wh.astype(in_dt)

        # (1) Per-slab H-axis resize into the f32 scratch: tmp[b] = WH @ img[b].
        def h_resize(b, carry):
            x = in_ref[b]
            if not is_float:
                x = x.astype(jnp.float32)
            tmp_ref[b] = jnp.dot(whc, x, preferred_element_type=jnp.float32)
            return carry
        lax.fori_loop(0, nb, h_resize, 0, unroll=unroll)

        # (2) Merged W-axis resize over the whole block:
        #     ONE (nb*H, W) @ (W, W) matmul (leading-dim merge is free).
        rows = tmp_ref[...].reshape(nb * h, w)
        out = jnp.dot(rows, wwt, preferred_element_type=jnp.float32)
        out_ref[...] = out.reshape(nb, h, w).astype(out_ref.dtype)

    resize_all(ct_ref, ct_out_ref)
    resize_all(mri_ref, mri_out_ref)


# --------------------------------------------------------------------------
# Generation-aware tiling heuristics
# --------------------------------------------------------------------------
def _tpu_vmem_and_cores():
    """(vmem_budget_bytes, vmem_limit_bytes, tensorcores_per_chip), safe fallbacks."""
    vmem_phys = 64 * 1024 * 1024          # conservative default = v7x (smallest VMEM)
    try:
        info = pltpu.get_tpu_info()
        vmem_phys = int(getattr(info, "vmem_capacity_bytes", vmem_phys))
    except Exception:
        pass
    kind = ""
    try:
        kind = jax.devices()[0].device_kind.lower()
    except Exception:
        pass
    num_cores = 2 if "v7" in kind else 1  # v7x: 2 TCs/chip; v5e/v6e: 1 TC

    if vmem_phys >= 100 * 1024 * 1024:    # v5e / v6e: 128 MiB physical VMEM
        vmem_limit = 100 * 1024 * 1024
        vmem_budget = 80 * 1024 * 1024
    else:                                  # v7x: 64 MiB physical VMEM
        vmem_limit = 48 * 1024 * 1024
        vmem_budget = 40 * 1024 * 1024
    # Never ask for more than ~3/4 of whatever physical VMEM was reported.
    vmem_limit = min(vmem_limit, max(16 * 1024 * 1024, vmem_phys * 3 // 4))
    vmem_budget = min(vmem_budget, vmem_limit * 5 // 6)
    return vmem_budget, vmem_limit, num_cores


def _choose_block_b(nc, h, w, itemsize, *, vmem_budget_bytes, num_cores):
    # Resident VMEM per grid step:
    #   interp weights (f32, double-buffered):      2 * 2 * 4 * (h*h + w*w)
    #   2 inputs + 2 outputs (double-buffered):      block_b * 8 * h*w*itemsize
    #   f32 scratch + merged-matmul result value:    block_b * 8 * h*w
    weight_bytes = 4 * 4 * (h * h + w * w)
    per_slab = h * w * (8 * itemsize + 8)
    cap = max(1, (vmem_budget_bytes - weight_bytes) // per_slab)

    if num_cores > 1 and nc > 1:
        # v7x: the (parallel) batch-block axis is sharded across both TCs ->
        # keep >= num_cores grid steps and try to make their count a multiple
        # of num_cores so neither core idles on a tail step.
        block_b = max(1, min(cap, pl.cdiv(nc, num_cores), nc))
        nb0 = pl.cdiv(nc, block_b)
        if nb0 % num_cores:
            nb_even = num_cores * pl.cdiv(nb0, num_cores)
            cand = max(1, pl.cdiv(nc, nb_even))
            if pl.cdiv(nc, cand) % num_cores == 0:
                block_b = cand
    else:
        # v5e / v6e: single TC -> grid is a sequential loop; take the biggest
        # block that fits (fewest grid steps, biggest merged matmul).
        block_b = min(cap, nc)
    return int(max(1, block_b))


# --------------------------------------------------------------------------
# Wrapper / glue
# --------------------------------------------------------------------------
def _resize_weights(out_size, crop_size, crop_offset, in_size):
    """(out_size, in_size) bilinear interpolation matrix for one axis."""
    o = jnp.arange(out_size, dtype=jnp.float32)
    src = jnp.clip((o + 0.5) * (crop_size / out_size) - 0.5, 0.0, crop_size - 1.0)
    lo = jnp.floor(src).astype(jnp.int32)
    frac = src - lo.astype(jnp.float32)
    hi = jnp.minimum(lo + 1, crop_size - 1)
    cols = jnp.arange(in_size, dtype=jnp.int32)[None, :]
    r0 = (crop_offset + lo)[:, None]
    r1 = (crop_offset + hi)[:, None]
    weights = ((1.0 - frac)[:, None] * (cols == r0).astype(jnp.float32)
               + frac[:, None] * (cols == r1).astype(jnp.float32))
    return weights


def _get_params(key, h, w, size):
    th, tw = size
    if h < th or w < tw:
        raise ValueError(
            f"Required crop size {(th, tw)} is larger than input image size {(h, w)}")
    if h == th and w == tw:
        return jnp.int32(0), jnp.int32(0)
    ki, kj = jax.random.split(key)
    i = jax.random.randint(ki, (), 0, h - th + 1, dtype=jnp.int32)
    j = jax.random.randint(kj, (), 0, w - tw + 1, dtype=jnp.int32)
    return i, j


def resized_crop_pallas(ct, mri, wh, wwt):
    """Apply out = WH @ img @ WW^T to every (n, c) slab of ct and mri (fused)."""
    assert ct.shape == mri.shape
    n, c, h, w = ct.shape
    nc = n * c
    ct_f = ct.reshape(nc, h, w)
    mri_f = mri.reshape(nc, h, w)

    vmem_budget, vmem_limit, num_cores = _tpu_vmem_and_cores()
    itemsize = max(jnp.dtype(ct.dtype).itemsize, jnp.dtype(mri.dtype).itemsize)
    block_b = _choose_block_b(nc, h, w, itemsize,
                              vmem_budget_bytes=vmem_budget, num_cores=num_cores)
    num_blocks = pl.cdiv(nc, block_b)   # non-divisible grids handled by Pallas

    img_spec = pl.BlockSpec((block_b, h, w), lambda i: (i, 0, 0))
    ct_o, mri_o = pl.pallas_call(
        _resized_crop_kernel,
        out_shape=(jax.ShapeDtypeStruct((nc, h, w), ct.dtype),
                   jax.ShapeDtypeStruct((nc, h, w), mri.dtype)),
        grid_spec=pltpu.PrefetchScalarGridSpec(
            num_scalar_prefetch=0,
            grid=(num_blocks,),
            in_specs=[
                pl.BlockSpec((h, h), lambda i: (0, 0)),   # WH   (constant index)
                pl.BlockSpec((w, w), lambda i: (0, 0)),   # WW^T (constant index)
                img_spec,                                  # ct slabs
                img_spec,                                  # mri slabs
            ],
            out_specs=[img_spec, img_spec],
            scratch_shapes=[pltpu.VMEM((block_b, h, w), jnp.float32)],
        ),
        compiler_params=pltpu.CompilerParams(
            dimension_semantics=("parallel",),
            vmem_limit_bytes=int(vmem_limit),
        ),
    )(wh.astype(jnp.float32), wwt.astype(jnp.float32), ct_f, mri_f)

    return (ct_o.reshape(n, c, h, w), mri_o.reshape(n, c, h, w))


class RandomCrop:
    """JAX/Pallas port of the torch RandomCrop module (operates on NCHW arrays)."""
    # TODO(synk): padding / pad_if_needed / fill / padding_mode branches
    # (PIL-style F.pad) are not implemented; only the default-argument path is.

    def __init__(self, size, padding=None, pad_if_needed=False, fill=0,
                 padding_mode="constant"):
        if isinstance(size, int):
            size = (size, size)
        self.size = tuple(int(s) for s in size)
        self.padding = padding
        self.pad_if_needed = pad_if_needed
        self.fill = fill
        self.padding_mode = padding_mode

    def __call__(self, key, ct, mri):
        n, c, h, w = ct.shape
        th, tw = self.size
        i, j = _get_params(key, h, w, (th, tw))       # one draw, shared by ct & mri
        wh = _resize_weights(h, th, i, h)             # (H_out, H_in)
        wwt = _resize_weights(w, tw, j, w).T          # (W_in, W_out)
        return resized_crop_pallas(ct, mri, wh, wwt)

    def __repr__(self):
        return f"{self.__class__.__name__}(size={self.size}, padding={self.padding})"


# --------------------------------------------------------------------------
# Pure-JAX reference (gather-based bilinear resized crop, f32)
# --------------------------------------------------------------------------
def _resized_crop_reference(x, i, j, th, tw):
    n, c, h, w = x.shape

    def coords(out_size, crop_size, off):
        o = jnp.arange(out_size, dtype=jnp.float32)
        src = jnp.clip((o + 0.5) * (crop_size / out_size) - 0.5, 0.0, crop_size - 1.0)
        lo = jnp.floor(src).astype(jnp.int32)
        frac = src - lo.astype(jnp.float32)
        hi = jnp.minimum(lo + 1, crop_size - 1)
        return off + lo, off + hi, frac

    y0, y1, fy = coords(h, th, i)
    x0, x1, fx = coords(w, tw, j)
    xf = x.astype(jnp.float32)
    row0 = xf[:, :, y0, :]
    row1 = xf[:, :, y1, :]
    top = row0[:, :, :, x0] * (1.0 - fx) + row0[:, :, :, x1] * fx
    bot = row1[:, :, :, x0] * (1.0 - fx) + row1[:, :, :, x1] * fx
    out = top * (1.0 - fy)[:, None] + bot * fy[:, None]
    return out.astype(x.dtype)


if __name__ == "__main__":
    key = jax.random.PRNGKey(0)
    k_ct, k_mri, k_crop = jax.random.split(key, 3)

    N, C, H, W = 2, 4, 16, 16
    ct = jax.random.normal(k_ct, (N, C, H, W), dtype=jnp.float32)
    mri = jax.random.normal(k_mri, (N, C, H, W), dtype=jnp.float32)

    module = RandomCrop(size=(8, 8))
    ct_o, mri_o = module(k_crop, ct, mri)
    jax.block_until_ready((ct_o, mri_o))

    # Reference check with the SAME crop parameters (same key / same draw).
    # The kernel uses DEFAULT MXU precision (single bf16 pass), so tolerances
    # are set for bf16-rounded operands rather than exact f32.
    th, tw = module.size
    i, j = _get_params(k_crop, H, W, (th, tw))
    ct_ref = _resized_crop_reference(ct, i, j, th, tw)
    mri_ref = _resized_crop_reference(mri, i, j, th, tw)
    assert ct_o.shape == ct.shape and mri_o.shape == mri.shape
    for got, ref in ((ct_o, ct_ref), (mri_o, mri_ref)):
        diff = jnp.abs(got.astype(jnp.float32) - ref.astype(jnp.float32))
        max_err = float(jnp.max(diff))
        mean_err = float(jnp.mean(diff))
        assert max_err < 5e-2, f"max error {max_err}"
        assert mean_err < 1e-2, f"mean error {mean_err}"

    print("KERNEL_OK")
</pallas_src>

<mosaic_0001>
module attributes {stable_mosaic.version = 11 : i64} {
  func.func @_resized_crop_kernel(%arg0: i32, %arg1: memref<16x16xf32, #tpu.memory_space<vmem>>, %arg2: memref<16x16xf32, #tpu.memory_space<vmem>>, %arg3: memref<8x16x16xf32, #tpu.memory_space<vmem>>, %arg4: memref<8x16x16xf32, #tpu.memory_space<vmem>>, %arg5: memref<8x16x16xf32, #tpu.memory_space<vmem>>, %arg6: memref<8x16x16xf32, #tpu.memory_space<vmem>>, %arg7: memref<8x16x16xf32, #tpu.memory_space<vmem>>) attributes {dimension_semantics = [#tpu.dimension_semantics<parallel>], iteration_bounds = array<i64: 1>, scalar_prefetch = 0 : i64, scratch_operands = 1 : i64, tpu.core_type = #tpu.core_type<tc>, window_params = [{pipeline_mode = #tpu.pipeline_mode<synchronous>, transform_indices = @transform_0, window_bounds = array<i64: 16, 16>}, {pipeline_mode = #tpu.pipeline_mode<synchronous>, transform_indices = @transform_1, window_bounds = array<i64: 16, 16>}, {transform_indices = @transform_2, window_bounds = array<i64: 8, 16, 16>}, {transform_indices = @transform_3, window_bounds = array<i64: 8, 16, 16>}, {transform_indices = @transform_4, window_bounds = array<i64: 8, 16, 16>}, {transform_indices = @transform_5, window_bounds = array<i64: 8, 16, 16>}]} {
    %c0 = arith.constant 0 : index
    %c0_0 = arith.constant 0 : index
    %0 = vector.load %arg1[%c0, %c0_0] : memref<16x16xf32, #tpu.memory_space<vmem>>, vector<16x16xf32>
    %c0_1 = arith.constant 0 : index
    %c0_2 = arith.constant 0 : index
    %1 = vector.load %arg2[%c0_1, %c0_2] : memref<16x16xf32, #tpu.memory_space<vmem>>, vector<16x16xf32>
    %c0_i32 = arith.constant 0 : i32
    %2 = arith.index_cast %c0_i32 : i32 to index
    %c0_3 = arith.constant 0 : index
    %c0_4 = arith.constant 0 : index
    %3 = vector.load %arg3[%2, %c0_3, %c0_4] : memref<8x16x16xf32, #tpu.memory_space<vmem>>, vector<1x16x16xf32>
    %4 = vector.shape_cast %3 : vector<1x16x16xf32> to vector<16x16xf32>
    %cst = arith.constant dense<0.000000e+00> : vector<16x16xf32>
    %5 = tpu.matmul %0, %4, %cst {dimension_numbers = #tpu.dot_dimension_numbers<[1], [0], [0], [1], [0, 0, 1, 1], [], []>} : vector<16x16xf32>, vector<16x16xf32>, vector<16x16xf32> -> vector<16x16xf32>
    %6 = arith.index_cast %c0_i32 : i32 to index
    %c0_5 = arith.constant 0 : index
    %c0_6 = arith.constant 0 : index
    %7 = vector.load %arg7[%6, %c0_5, %c0_6] : memref<8x16x16xf32, #tpu.memory_space<vmem>>, vector<1x16x16xf32>
    %8 = vector.shape_cast %7 : vector<1x16x16xf32> to vector<16x16xf32>
    %9 = vector.shape_cast %5 : vector<16x16xf32> to vector<1x16x16xf32>
    tpu.vector_store %arg7[%6, %c0_5, %c0_6], %9 {strides = array<i32>} : memref<8x16x16xf32, #tpu.memory_space<vmem>>, vector<1x16x16xf32>,
    %c1_i32 = arith.constant 1 : i32
    %10 = arith.index_cast %c1_i32 : i32 to index
    %c0_7 = arith.constant 0 : index
    %c0_8 = arith.constant 0 : index
    %11 = vector.load %arg3[%10, %c0_7, %c0_8] : memref<8x16x16xf32, #tpu.memory_space<vmem>>, vector<1x16x16xf32>
    %12 = vector.shape_cast %11 : vector<1x16x16xf32> to vector<16x16xf32>
    %cst_9 = arith.constant dense<0.000000e+00> : vector<16x16xf32>
    %13 = tpu.matmul %0, %12, %cst_9 {dimension_numbers = #tpu.dot_dimension_numbers<[1], [0], [0], [1], [0, 0, 1, 1], [], []>} : vector<16x16xf32>, vector<16x16xf32>, vector<16x16xf32> -> vector<16x16xf32>
    %14 = arith.index_cast %c1_i32 : i32 to index
    %c0_10 = arith.constant 0 : index
    %c0_11 = arith.constant 0 : index
    %15 = vector.load %arg7[%14, %c0_10, %c0_11] : memref<8x16x16xf32, #tpu.memory_space<vmem>>, vector<1x16x16xf32>
    %16 = vector.shape_cast %15 : vector<1x16x16xf32> to vector<16x16xf32>
    %17 = vector.shape_cast %13 : vector<16x16xf32> to vector<1x16x16xf32>
    tpu.vector_store %arg7[%14, %c0_10, %c0_11], %17 {strides = array<i32>} : memref<8x16x16xf32, #tpu.memory_space<vmem>>, vector<1x16x16xf32>,
    %c2_i32 = arith.constant 2 : i32
    %18 = arith.index_cast %c2_i32 : i32 to index
    %c0_12 = arith.constant 0 : index
    %c0_13 = arith.constant 0 : index
    %19 = vector.load %arg3[%18, %c0_12, %c0_13] : memref<8x16x16xf32, #tpu.memory_space<vmem>>, vector<1x16x16xf32>
    %20 = vector.shape_cast %19 : vector<1x16x16xf32> to vector<16x16xf32>
    %cst_14 = arith.constant dense<0.000000e+00> : vector<16x16xf32>
    %21 = tpu.matmul %0, %20, %cst_14 {dimension_numbers = #tpu.dot_dimension_numbers<[1], [0], [0], [1], [0, 0, 1, 1], [], []>} : vector<16x16xf32>, vector<16x16xf32>, vector<16x16xf32> -> vector<16x16xf32>
    %22 = arith.index_cast %c2_i32 : i32 to index
    %c0_15 = arith.constant 0 : index
    %c0_16 = arith.constant 0 : index
    %23 = vector.load %arg7[%22, %c0_15, %c0_16] : memref<8x16x16xf32, #tpu.memory_space<vmem>>, vector<1x16x16xf32>
    %24 = vector.shape_cast %23 : vector<1x16x16xf32> to vector<16x16xf32>
    %25 = vector.shape_cast %21 : vector<16x16xf32> to vector<1x16x16xf32>
    tpu.vector_store %arg7[%22, %c0_15, %c0_16], %25 {strides = array<i32>} : memref<8x16x16xf32, #tpu.memory_space<vmem>>, vector<1x16x16xf32>,
    %c3_i32 = arith.constant 3 : i32
    %26 = arith.index_cast %c3_i32 : i32 to index
    %c0_17 = arith.constant 0 : index
    %c0_18 = arith.constant 0 : index
    %27 = vector.load %arg3[%26, %c0_17, %c0_18] : memref<8x16x16xf32, #tpu.memory_space<vmem>>, vector<1x16x16xf32>
    %28 = vector.shape_cast %27 : vector<1x16x16xf32> to vector<16x16xf32>
    %cst_19 = arith.constant dense<0.000000e+00> : vector<16x16xf32>
    %29 = tpu.matmul %0, %28, %cst_19 {dimension_numbers = #tpu.dot_dimension_numbers<[1], [0], [0], [1], [0, 0, 1, 1], [], []>} : vector<16x16xf32>, vector<16x16xf32>, vector<16x16xf32> -> vector<16x16xf32>
    %30 = arith.index_cast %c3_i32 : i32 to index
    %c0_20 = arith.constant 0 : index
    %c0_21 = arith.constant 0 : index
    %31 = vector.load %arg7[%30, %c0_20, %c0_21] : memref<8x16x16xf32, #tpu.memory_space<vmem>>, vector<1x16x16xf32>
    %32 = vector.shape_cast %31 : vector<1x16x16xf32> to vector<16x16xf32>
    %33 = vector.shape_cast %29 : vector<16x16xf32> to vector<1x16x16xf32>
    tpu.vector_store %arg7[%30, %c0_20, %c0_21], %33 {strides = array<i32>} : memref<8x16x16xf32, #tpu.memory_space<vmem>>, vector<1x16x16xf32>,
    %c4_i32 = arith.constant 4 : i32
    %34 = arith.index_cast %c4_i32 : i32 to index
    %c0_22 = arith.constant 0 : index
    %c0_23 = arith.constant 0 : index
    %35 = vector.load %arg3[%34, %c0_22, %c0_23] : memref<8x16x16xf32, #tpu.memory_space<vmem>>, vector<1x16x16xf32>
    %36 = vector.shape_cast %35 : vector<1x16x16xf32> to vector<16x16xf32>
    %cst_24 = arith.constant dense<0.000000e+00> : vector<16x16xf32>
    %37 = tpu.matmul %0, %36, %cst_24 {dimension_numbers = #tpu.dot_dimension_numbers<[1], [0], [0], [1], [0, 0, 1, 1], [], []>} : vector<16x16xf32>, vector<16x16xf32>, vector<16x16xf32> -> vector<16x16xf32>
    %38 = arith.index_cast %c4_i32 : i32 to index
    %c0_25 = arith.constant 0 : index
    %c0_26 = arith.constant 0 : index
    %39 = vector.load %arg7[%38, %c0_25, %c0_26] : memref<8x16x16xf32, #tpu.memory_space<vmem>>, vector<1x16x16xf32>
    %40 = vector.shape_cast %39 : vector<1x16x16xf32> to vector<16x16xf32>
    %41 = vector.shape_cast %37 : vector<16x16xf32> to vector<1x16x16xf32>
    tpu.vector_store %arg7[%38, %c0_25, %c0_26], %41 {strides = array<i32>} : memref<8x16x16xf32, #tpu.memory_space<vmem>>, vector<1x16x16xf32>,
    %c5_i32 = arith.constant 5 : i32
    %42 = arith.index_cast %c5_i32 : i32 to index
    %c0_27 = arith.constant 0 : index
    %c0_28 = arith.constant 0 : index
    %43 = vector.load %arg3[%42, %c0_27, %c0_28] : memref<8x16x16xf32, #tpu.memory_space<vmem>>, vector<1x16x16xf32>
    %44 = vector.shape_cast %43 : vector<1x16x16xf32> to vector<16x16xf32>
    %cst_29 = arith.constant dense<0.000000e+00> : vector<16x16xf32>
    %45 = tpu.matmul %0, %44, %cst_29 {dimension_numbers = #tpu.dot_dimension_numbers<[1], [0], [0], [1], [0, 0, 1, 1], [], []>} : vector<16x16xf32>, vector<16x16xf32>, vector<16x16xf32> -> vector<16x16xf32>
    %46 = arith.index_cast %c5_i32 : i32 to index
    %c0_30 = arith.constant 0 : index
    %c0_31 = arith.constant 0 : index
    %47 = vector.load %arg7[%46, %c0_30, %c0_31] : memref<8x16x16xf32, #tpu.memory_space<vmem>>, vector<1x16x16xf32>
    %48 = vector.shape_cast %47 : vector<1x16x16xf32> to vector<16x16xf32>
    %49 = vector.shape_cast %45 : vector<16x16xf32> to vector<1x16x16xf32>
    tpu.vector_store %arg7[%46, %c0_30, %c0_31], %49 {strides = array<i32>} : memref<8x16x16xf32, #tpu.memory_space<vmem>>, vector<1x16x16xf32>,
    %c6_i32 = arith.constant 6 : i32
    %50 = arith.index_cast %c6_i32 : i32 to index
    %c0_32 = arith.constant 0 : index
    %c0_33 = arith.constant 0 : index
    %51 = vector.load %arg3[%50, %c0_32, %c0_33] : memref<8x16x16xf32, #tpu.memory_space<vmem>>, vector<1x16x16xf32>
    %52 = vector.shape_cast %51 : vector<1x16x16xf32> to vector<16x16xf32>
    %cst_34 = arith.constant dense<0.000000e+00> : vector<16x16xf32>
    %53 = tpu.matmul %0, %52, %cst_34 {dimension_numbers = #tpu.dot_dimension_numbers<[1], [0], [0], [1], [0, 0, 1, 1], [], []>} : vector<16x16xf32>, vector<16x16xf32>, vector<16x16xf32> -> vector<16x16xf32>
    %54 = arith.index_cast %c6_i32 : i32 to index
    %c0_35 = arith.constant 0 : index
    %c0_36 = arith.constant 0 : index
    %55 = vector.load %arg7[%54, %c0_35, %c0_36] : memref<8x16x16xf32, #tpu.memory_space<vmem>>, vector<1x16x16xf32>
    %56 = vector.shape_cast %55 : vector<1x16x16xf32> to vector<16x16xf32>
    %57 = vector.shape_cast %53 : vector<16x16xf32> to vector<1x16x16xf32>
    tpu.vector_store %arg7[%54, %c0_35, %c0_36], %57 {strides = array<i32>} : memref<8x16x16xf32, #tpu.memory_space<vmem>>, vector<1x16x16xf32>,
    %c7_i32 = arith.constant 7 : i32
    %58 = arith.index_cast %c7_i32 : i32 to index
    %c0_37 = arith.constant 0 : index
    %c0_38 = arith.constant 0 : index
    %59 = vector.load %arg3[%58, %c0_37, %c0_38] : memref<8x16x16xf32, #tpu.memory_space<vmem>>, vector<1x16x16xf32>
    %60 = vector.shape_cast %59 : vector<1x16x16xf32> to vector<16x16xf32>
    %cst_39 = arith.constant dense<0.000000e+00> : vector<16x16xf32>
    %61 = tpu.matmul %0, %60, %cst_39 {dimension_numbers = #tpu.dot_dimension_numbers<[1], [0], [0], [1], [0, 0, 1, 1], [], []>} : vector<16x16xf32>, vector<16x16xf32>, vector<16x16xf32> -> vector<16x16xf32>
    %62 = arith.index_cast %c7_i32 : i32 to index
    %c0_40 = arith.constant 0 : index
    %c0_41 = arith.constant 0 : index
    %63 = vector.load %arg7[%62, %c0_40, %c0_41] : memref<8x16x16xf32, #tpu.memory_space<vmem>>, vector<1x16x16xf32>
    %64 = vector.shape_cast %63 : vector<1x16x16xf32> to vector<16x16xf32>
    %65 = vector.shape_cast %61 : vector<16x16xf32> to vector<1x16x16xf32>
    tpu.vector_store %arg7[%62, %c0_40, %c0_41], %65 {strides = array<i32>} : memref<8x16x16xf32, #tpu.memory_space<vmem>>, vector<1x16x16xf32>,
    %c8_i32 = arith.constant 8 : i32
    %c0_42 = arith.constant 0 : index
    %c0_43 = arith.constant 0 : index
    %c0_44 = arith.constant 0 : index
    %66 = vector.load %arg7[%c0_42, %c0_43, %c0_44] : memref<8x16x16xf32, #tpu.memory_space<vmem>>, vector<8x16x16xf32>
    %67 = vector.shape_cast %66 : vector<8x16x16xf32> to vector<128x16xf32>
    %cst_45 = arith.constant dense<0.000000e+00> : vector<128x16xf32>
    %68 = tpu.matmul %67, %1, %cst_45 {dimension_numbers = #tpu.dot_dimension_numbers<[1], [0], [0], [1], [0, 0, 1, 1], [], []>} : vector<128x16xf32>, vector<16x16xf32>, vector<128x16xf32> -> vector<128x16xf32>
    %69 = vector.shape_cast %68 : vector<128x16xf32> to vector<8x16x16xf32>
    %c0_46 = arith.constant 0 : index
    %c0_47 = arith.constant 0 : index
    %c0_48 = arith.constant 0 : index
    %70 = vector.load %arg5[%c0_46, %c0_47, %c0_48] : memref<8x16x16xf32, #tpu.memory_space<vmem>>, vector<8x16x16xf32>
    tpu.vector_store %arg5[%c0_46, %c0_47, %c0_48], %69 {strides = array<i32>} : memref<8x16x16xf32, #tpu.memory_space<vmem>>, vector<8x16x16xf32>,
    %c0_i32_49 = arith.constant 0 : i32
    %71 = arith.index_cast %c0_i32_49 : i32 to index
    %c0_50 = arith.constant 0 : index
    %c0_51 = arith.constant 0 : index
    %72 = vector.load %arg4[%71, %c0_50, %c0_51] : memref<8x16x16xf32, #tpu.memory_space<vmem>>, vector<1x16x16xf32>
    %73 = vector.shape_cast %72 : vector<1x16x16xf32> to vector<16x16xf32>
    %cst_52 = arith.constant dense<0.000000e+00> : vector<16x16xf32>
    %74 = tpu.matmul %0, %73, %cst_52 {dimension_numbers = #tpu.dot_dimension_numbers<[1], [0], [0], [1], [0, 0, 1, 1], [], []>} : vector<16x16xf32>, vector<16x16xf32>, vector<16x16xf32> -> vector<16x16xf32>
    %75 = arith.index_cast %c0_i32_49 : i32 to index
    %c0_53 = arith.constant 0 : index
    %c0_54 = arith.constant 0 : index
    %76 = vector.load %arg7[%75, %c0_53, %c0_54] : memref<8x16x16xf32, #tpu.memory_space<vmem>>, vector<1x16x16xf32>
    %77 = vector.shape_cast %76 : vector<1x16x16xf32> to vector<16x16xf32>
    %78 = vector.shape_cast %74 : vector<16x16xf32> to vector<1x16x16xf32>
    tpu.vector_store %arg7[%75, %c0_53, %c0_54], %78 {strides = array<i32>} : memref<8x16x16xf32, #tpu.memory_space<vmem>>, vector<1x16x16xf32>,
    %c1_i32_55 = arith.constant 1 : i32
    %79 = arith.index_cast %c1_i32_55 : i32 to index
    %c0_56 = arith.constant 0 : index
    %c0_57 = arith.constant 0 : index
    %80 = vector.load %arg4[%79, %c0_56, %c0_57] : memref<8x16x16xf32, #tpu.memory_space<vmem>>, vector<1x16x16xf32>
    %81 = vector.shape_cast %80 : vector<1x16x16xf32> to vector<16x16xf32>
    %cst_58 = arith.constant dense<0.000000e+00> : vector<16x16xf32>
    %82 = tpu.matmul %0, %81, %cst_58 {dimension_numbers = #tpu.dot_dimension_numbers<[1], [0], [0], [1], [0, 0, 1, 1], [], []>} : vector<16x16xf32>, vector<16x16xf32>, vector<16x16xf32> -> vector<16x16xf32>
    %83 = arith.index_cast %c1_i32_55 : i32 to index
    %c0_59 = arith.constant 0 : index
    %c0_60 = arith.constant 0 : index
    %84 = vector.load %arg7[%83, %c0_59, %c0_60] : memref<8x16x16xf32, #tpu.memory_space<vmem>>, vector<1x16x16xf32>
    %85 = vector.shape_cast %84 : vector<1x16x16xf32> to vector<16x16xf32>
    %86 = vector.shape_cast %82 : vector<16x16xf32> to vector<1x16x16xf32>
    tpu.vector_store %arg7[%83, %c0_59, %c0_60], %86 {strides = array<i32>} : memref<8x16x16xf32, #tpu.memory_space<vmem>>, vector<1x16x16xf32>,
    %c2_i32_61 = arith.constant 2 : i32
    %87 = arith.index_cast %c2_i32_61 : i32 to index
    %c0_62 = arith.constant 0 : index
    %c0_63 = arith.constant 0 : index
    %88 = vector.load %arg4[%87, %c0_62, %c0_63] : memref<8x16x16xf32, #tpu.memory_space<vmem>>, vector<1x16x16xf32>
    %89 = vector.shape_cast %88 : vector<1x16x16xf32> to vector<16x16xf32>
    %cst_64 = arith.constant dense<0.000000e+00> : vector<16x16xf32>
    %90 = tpu.matmul %0, %89, %cst_64 {dimension_numbers = #tpu.dot_dimension_numbers<[1], [0], [0], [1], [0, 0, 1, 1], [], []>} : vector<16x16xf32>, vector<16x16xf32>, vector<16x16xf32> -> vector<16x16xf32>
    %91 = arith.index_cast %c2_i32_61 : i32 to index
    %c0_65 = arith.constant 0 : index
    %c0_66 = arith.constant 0 : index
    %92 = vector.load %arg7[%91, %c0_65, %c0_66] : memref<8x16x16xf32, #tpu.memory_space<vmem>>, vector<1x16x16xf32>
    %93 = vector.shape_cast %92 : vector<1x16x16xf32> to vector<16x16xf32>
    %94 = vector.shape_cast %90 : vector<16x16xf32> to vector<1x16x16xf32>
    tpu.vector_store %arg7[%91, %c0_65, %c0_66], %94 {strides = array<i32>} : memref<8x16x16xf32, #tpu.memory_space<vmem>>, vector<1x16x16xf32>,
    %c3_i32_67 = arith.constant 3 : i32
    %95 = arith.index_cast %c3_i32_67 : i32 to index
    %c0_68 = arith.constant 0 : index
    %c0_69 = arith.constant 0 : index
    %96 = vector.load %arg4[%95, %c0_68, %c0_69] : memref<8x16x16xf32, #tpu.memory_space<vmem>>, vector<1x16x16xf32>
    %97 = vector.shape_cast %96 : vector<1x16x16xf32> to vector<16x16xf32>
    %cst_70 = arith.constant dense<0.000000e+00> : vector<16x16xf32>
    %98 = tpu.matmul %0, %97, %cst_70 {dimension_numbers = #tpu.dot_dimension_numbers<[1], [0], [0], [1], [0, 0, 1, 1], [], []>} : vector<16x16xf32>, vector<16x16xf32>, vector<16x16xf32> -> vector<16x16xf32>
    %99 = arith.index_cast %c3_i32_67 : i32 to index
    %c0_71 = arith.constant 0 : index
    %c0_72 = arith.constant 0 : index
    %100 = vector.load %arg7[%99, %c0_71, %c0_72] : memref<8x16x16xf32, #tpu.memory_space<vmem>>, vector<1x16x16xf32>
    %101 = vector.shape_cast %100 : vector<1x16x16xf32> to vector<16x16xf32>
    %102 = vector.shape_cast %98 : vector<16x16xf32> to vector<1x16x16xf32>
    tpu.vector_store %arg7[%99, %c0_71, %c0_72], %102 {strides = array<i32>} : memref<8x16x16xf32, #tpu.memory_space<vmem>>, vector<1x16x16xf32>,
    %c4_i32_73 = arith.constant 4 : i32
    %103 = arith.index_cast %c4_i32_73 : i32 to index
    %c0_74 = arith.constant 0 : index
    %c0_75 = arith.constant 0 : index
    %104 = vector.load %arg4[%103, %c0_74, %c0_75] : memref<8x16x16xf32, #tpu.memory_space<vmem>>, vector<1x16x16xf32>
    %105 = vector.shape_cast %104 : vector<1x16x16xf32> to vector<16x16xf32>
    %cst_76 = arith.constant dense<0.000000e+00> : vector<16x16xf32>
    %106 = tpu.matmul %0, %105, %cst_76 {dimension_numbers = #tpu.dot_dimension_numbers<[1], [0], [0], [1], [0, 0, 1, 1], [], []>} : vector<16x16xf32>, vector<16x16xf32>, vector<16x16xf32> -> vector<16x16xf32>
    %107 = arith.index_cast %c4_i32_73 : i32 to index
    %c0_77 = arith.constant 0 : index
    %c0_78 = arith.constant 0 : index
    %108 = vector.load %arg7[%107, %c0_77, %c0_78] : memref<8x16x16xf32, #tpu.memory_space<vmem>>, vector<1x16x16xf32>
    %109 = vector.shape_cast %108 : vector<1x16x16xf32> to vector<16x16xf32>
    %110 = vector.shape_cast %106 : vector<16x16xf32> to vector<1x16x16xf32>
    tpu.vector_store %arg7[%107, %c0_77, %c0_78], %110 {strides = array<i32>} : memref<8x16x16xf32, #tpu.memory_space<vmem>>, vector<1x16x16xf32>,
    %c5_i32_79 = arith.constant 5 : i32
    %111 = arith.index_cast %c5_i32_79 : i32 to index
    %c0_80 = arith.constant 0 : index
    %c0_81 = arith.constant 0 : index
    %112 = vector.load %arg4[%111, %c0_80, %c0_81] : memref<8x16x16xf32, #tpu.memory_space<vmem>>, vector<1x16x16xf32>
    %113 = vector.shape_cast %112 : vector<1x16x16xf32> to vector<16x16xf32>
    %cst_82 = arith.constant dense<0.000000e+00> : vector<16x16xf32>
    %114 = tpu.matmul %0, %113, %cst_82 {dimension_numbers = #tpu.dot_dimension_numbers<[1], [0], [0], [1], [0, 0, 1, 1], [], []>} : vector<16x16xf32>, vector<16x16xf32>, vector<16x16xf32> -> vector<16x16xf32>
    %115 = arith.index_cast %c5_i32_79 : i32 to index
    %c0_83 = arith.constant 0 : index
    %c0_84 = arith.constant 0 : index
    %116 = vector.load %arg7[%115, %c0_83, %c0_84] : memref<8x16x16xf32, #tpu.memory_space<vmem>>, vector<1x16x16xf32>
    %117 = vector.shape_cast %116 : vector<1x16x16xf32> to vector<16x16xf32>
    %118 = vector.shape_cast %114 : vector<16x16xf32> to vector<1x16x16xf32>
    tpu.vector_store %arg7[%115, %c0_83, %c0_84], %118 {strides = array<i32>} : memref<8x16x16xf32, #tpu.memory_space<vmem>>, vector<1x16x16xf32>,
    %c6_i32_85 = arith.constant 6 : i32
    %119 = arith.index_cast %c6_i32_85 : i32 to index
    %c0_86 = arith.constant 0 : index
    %c0_87 = arith.constant 0 : index
    %120 = vector.load %arg4[%119, %c0_86, %c0_87] : memref<8x16x16xf32, #tpu.memory_space<vmem>>, vector<1x16x16xf32>
    %121 = vector.shape_cast %120 : vector<1x16x16xf32> to vector<16x16xf32>
    %cst_88 = arith.constant dense<0.000000e+00> : vector<16x16xf32>
    %122 = tpu.matmul %0, %121, %cst_88 {dimension_numbers = #tpu.dot_dimension_numbers<[1], [0], [0], [1], [0, 0, 1, 1], [], []>} : vector<16x16xf32>, vector<16x16xf32>, vector<16x16xf32> -> vector<16x16xf32>
    %123 = arith.index_cast %c6_i32_85 : i32 to index
    %c0_89 = arith.constant 0 : index
    %c0_90 = arith.constant 0 : index
    %124 = vector.load %arg7[%123, %c0_89, %c0_90] : memref<8x16x16xf32, #tpu.memory_space<vmem>>, vector<1x16x16xf32>
    %125 = vector.shape_cast %124 : vector<1x16x16xf32> to vector<16x16xf32>
    %126 = vector.shape_cast %122 : vector<16x16xf32> to vector<1x16x16xf32>
    tpu.vector_store %arg7[%123, %c0_89, %c0_90], %126 {strides = array<i32>} : memref<8x16x16xf32, #tpu.memory_space<vmem>>, vector<1x16x16xf32>,
    %c7_i32_91 = arith.constant 7 : i32
    %127 = arith.index_cast %c7_i32_91 : i32 to index
    %c0_92 = arith.constant 0 : index
    %c0_93 = arith.constant 0 : index
    %128 = vector.load %arg4[%127, %c0_92, %c0_93] : memref<8x16x16xf32, #tpu.memory_space<vmem>>, vector<1x16x16xf32>
    %129 = vector.shape_cast %128 : vector<1x16x16xf32> to vector<16x16xf32>
    %cst_94 = arith.constant dense<0.000000e+00> : vector<16x16xf32>
    %130 = tpu.matmul %0, %129, %cst_94 {dimension_numbers = #tpu.dot_dimension_numbers<[1], [0], [0], [1], [0, 0, 1, 1], [], []>} : vector<16x16xf32>, vector<16x16xf32>, vector<16x16xf32> -> vector<16x16xf32>
    %131 = arith.index_cast %c7_i32_91 : i32 to index
    %c0_95 = arith.constant 0 : index
    %c0_96 = arith.constant 0 : index
    %132 = vector.load %arg7[%131, %c0_95, %c0_96] : memref<8x16x16xf32, #tpu.memory_space<vmem>>, vector<1x16x16xf32>
    %133 = vector.shape_cast %132 : vector<1x16x16xf32> to vector<16x16xf32>
    %134 = vector.shape_cast %130 : vector<16x16xf32> to vector<1x16x16xf32>
    tpu.vector_store %arg7[%131, %c0_95, %c0_96], %134 {strides = array<i32>} : memref<8x16x16xf32, #tpu.memory_space<vmem>>, vector<1x16x16xf32>,
    %c8_i32_97 = arith.constant 8 : i32
    %c0_98 = arith.constant 0 : index
    %c0_99 = arith.constant 0 : index
    %c0_100 = arith.constant 0 : index
    %135 = vector.load %arg7[%c0_98, %c0_99, %c0_100] : memref<8x16x16xf32, #tpu.memory_space<vmem>>, vector<8x16x16xf32>
    %136 = vector.shape_cast %135 : vector<8x16x16xf32> to vector<128x16xf32>
    %cst_101 = arith.constant dense<0.000000e+00> : vector<128x16xf32>
    %137 = tpu.matmul %136, %1, %cst_101 {dimension_numbers = #tpu.dot_dimension_numbers<[1], [0], [0], [1], [0, 0, 1, 1], [], []>} : vector<128x16xf32>, vector<16x16xf32>, vector<128x16xf32> -> vector<128x16xf32>
    %138 = vector.shape_cast %137 : vector<128x16xf32> to vector<8x16x16xf32>
    %c0_102 = arith.constant 0 : index
    %c0_103 = arith.constant 0 : index
    %c0_104 = arith.constant 0 : index
    %139 = vector.load %arg6[%c0_102, %c0_103, %c0_104] : memref<8x16x16xf32, #tpu.memory_space<vmem>>, vector<8x16x16xf32>
    tpu.vector_store %arg6[%c0_102, %c0_103, %c0_104], %138 {strides = array<i32>} : memref<8x16x16xf32, #tpu.memory_space<vmem>>, vector<8x16x16xf32>,
    return
  }
  func.func @transform_0(%arg0: i32) -> (i32, i32) {
    %c0_i32 = arith.constant 0 : i32
    %c0_i32_0 = arith.constant 0 : i32
    %c0_i32_1 = arith.constant 0 : i32
    return %c0_i32, %c0_i32_0 : i32, i32
  }
  func.func @transform_1(%arg0: i32) -> (i32, i32) {
    %c0_i32 = arith.constant 0 : i32
    %c0_i32_0 = arith.constant 0 : i32
    %c0_i32_1 = arith.constant 0 : i32
    return %c0_i32, %c0_i32_0 : i32, i32
  }
  func.func @transform_2(%arg0: i32) -> (i32, i32, i32) {
    %c0_i32 = arith.constant 0 : i32
    %c0_i32_0 = arith.constant 0 : i32
    %c0_i32_1 = arith.constant 0 : i32
    return %arg0, %c0_i32, %c0_i32_0 : i32, i32, i32
  }
  func.func @transform_3(%arg0: i32) -> (i32, i32, i32) {
    %c0_i32 = arith.constant 0 : i32
    %c0_i32_0 = arith.constant 0 : i32
    %c0_i32_1 = arith.constant 0 : i32
    return %arg0, %c0_i32, %c0_i32_0 : i32, i32, i32
  }
  func.func @transform_4(%arg0: i32) -> (i32, i32, i32) {
    %c0_i32 = arith.constant 0 : i32
    %c0_i32_0 = arith.constant 0 : i32
    %c0_i32_1 = arith.constant 0 : i32
    return %arg0, %c0_i32, %c0_i32_0 : i32, i32, i32
  }
  func.func @transform_5(%arg0: i32) -> (i32, i32, i32) {
    %c0_i32 = arith.constant 0 : i32
    %c0_i32_0 = arith.constant 0 : i32
    %c0_i32_1 = arith.constant 0 : i32
    return %arg0, %c0_i32, %c0_i32_0 : i32, i32, i32
  }
}

</mosaic_0001>

<bundles_post_ra>
// kernel: tpu_custom_call.1
= control target key start
LH: loop header
LB: loop body
LE: loop exit
PB: predicated region body
PF: predicated region fallthrough
CT: control target
= control target key end

     0   :  { %11 = vsyncpa [#allocation4], 0  ;;  %s2569_s0 = inlined_call_operand.hbm [shape: f32[16,16], index: 0, kind: input, shape index: {}]   ;;  %s2570_s1 = inlined_call_operand.hbm [shape: f32[16,16], index: 1, kind: input, shape index: {}]   ;;  %s2571_s2 = inlined_call_operand.hbm [shape: f32[8,16,16], index: 2, kind: input, shape index: {}]   ;;  %s2572_s3 = inlined_call_operand.hbm [shape: f32[8,16,16], index: 3, kind: input, shape index: {}]   ;;  %s2573_s4 = inlined_call_operand.hbm [shape: f32[8,16,16], index: 4, kind: output, shape index: {0}]   ;;  %s2574_s5 = inlined_call_operand.hbm [shape: f32[8,16,16], index: 5, kind: output, shape index: {1}]  }
   0x1   :  { %12 = vsyncpa [#allocation7], 0 }
   0x2   :  { %13 = vsyncpa [#allocation10], 0 }
   0x3   :  { %14 = vsyncpa [#allocation5], 0 }
   0x4   :  { %15 = vsyncpa [#allocation13], 0  ;;  %s2331_s18 = smov [#allocation6]   ;;  %s2332_s20 = smov [#allocation3]  }
   0x5   :  { %s33_s19 = sshll.u32 %s2331_s18, 4  ;;  %s21_s21 = sshll.u32 %s2332_s20, 4  ;;  %s34_s19 = int_to_ptr.vmem [resolvable:$true] %s33_s19  ;;  %s22_s21 = int_to_ptr.vmem [resolvable:$true] %s21_s21 }
   0x6   :  { %s2209_s22 = scalar_lea.vmem %s34_s19, 256  ;;  %p2214_p1 = scmp.lt.s32.totalorder %s34_s19, %s34_s19 }
   0x7   :  { %p2210_p0 = scmp.ne.s32.totalorder %s34_s19, %s2209_s22  ;;  %p2215_p2 = scmp.lt.s32.totalorder %s2209_s22, %s2209_s22 }
   0x9   :  { %p2216_p3 = por %p2215_p2, %p2214_p1 }
   0xb   :  { %p2217_p4 = pnand %p2216_p3, %p2210_p0 }
   0xd   :  { %2220 = shalt.err (!%p2217_p4)
}
   0xe   :  { %s2333_s23 = smov 128   ;;  %s2334_s24 = smov 8  }
   0xf   :  { %39 = dma.hbm_to_vmem [thread:$0]  %s2570_s1, 256, %s34_s19, [#allocation7], %s2333_s23, %s2333_s23, %s2334_s24  }
  0x10   :  { %s2229_s27 = scalar_lea.vmem %s22_s21, 256  ;;  %p2234_p6 = scmp.lt.s32.totalorder %s22_s21, %s22_s21 }
  0x11   :  { %p2230_p5 = scmp.ne.s32.totalorder %s22_s21, %s2229_s27  ;;  %p2235_p7 = scmp.lt.s32.totalorder %s2229_s27, %s2229_s27 }
  0x13   :  { %p2236_p8 = por %p2235_p7, %p2234_p6 }
  0x15   :  { %p2237_p9 = pnand %p2236_p8, %p2230_p5 }
  0x17   :  { %2240 = shalt.err (!%p2237_p9)
}
  0x18   :  { %27 = dma.hbm_to_vmem [thread:$0]  %s2569_s0, 256, %s22_s21, [#allocation4], %s2333_s23, %s2333_s23, %s2334_s24  }
  0x19   :  { %s2335_s30 = smov [#allocation8]   ;;  %s2336_s7 = smov [#allocation9]  }
  0x1a   :  { %s45_s6 = sshll.u32 %s2335_s30, 4  ;;  %s57_s8 = sshll.u32 %s2336_s7, 4  ;;  %s46_s6 = int_to_ptr.vmem [resolvable:$true] %s45_s6  ;;  %s58_s8 = int_to_ptr.vmem [resolvable:$true] %s57_s8 }
  0x1b   :  { %s2249_s1 = scalar_lea.vmem %s46_s6, 2048  ;;  %p2254_p11 = scmp.lt.s32.totalorder %s46_s6, %s46_s6 }
  0x1c   :  { %p2250_p10 = scmp.ne.s32.totalorder %s46_s6, %s2249_s1  ;;  %p2255_p12 = scmp.lt.s32.totalorder %s2249_s1, %s2249_s1 }
  0x1e   :  { %p2256_p13 = por %p2255_p12, %p2254_p11 }
  0x20   :  { %p2257_p0 = pnand %p2256_p13, %p2250_p10 }
  0x22   :  { %2260 = shalt.err (!%p2257_p0)
}
  0x23   :  { %51 = dma.hbm_to_vmem [thread:$0]  %s2571_s2, 2048, %s46_s6, [#allocation7], %s2333_s23, %s2333_s23, %s2334_s24  }
  0x24   :  { %s2269_s0 = scalar_lea.vmem %s58_s8, 2048  ;;  %p2274_p2 = scmp.lt.s32.totalorder %s58_s8, %s58_s8 }
  0x25   :  { %p2270_p1 = scmp.ne.s32.totalorder %s58_s8, %s2269_s0  ;;  %p2275_p3 = scmp.lt.s32.totalorder %s2269_s0, %s2269_s0 }
  0x27   :  { %p2276_p4 = por %p2275_p3, %p2274_p2 }
  0x29   :  { %p2277_p5 = pnand %p2276_p4, %p2270_p1 }
  0x2b   :  { %2280 = shalt.err (!%p2277_p5)
}
  0x2c   :  { %63 = dma.hbm_to_vmem [thread:$0]  %s2572_s3, 2048, %s58_s8, [#allocation10], %s2333_s23, %s2333_s23, %s2334_s24  }
  0x2d   :  { %2321 = dma.done.wait [#allocation4], 256  }
  0x2e   :  { %2322 = vsyncadd [#allocation4], 4294967040 }
  0x2f   :  { %2323 = dma.done.wait [#allocation7], 2304  }
  0x30   :  { %2324 = vsyncadd [#allocation7], 4294964992 }
  0x31   :  { %2325 = dma.done.wait [#allocation10], 2048  }
  0x32   :  { %2326 = vsyncadd [#allocation10], 4294965248  ;;  %vm82_vm0 = vcmask 130048   ;;  %v81_v0 = vld [vmem:[#allocation8 + $0x8] sm:$0xff]  ;;  %v80_v1 = vld [vmem:[#allocation8] sm:$0xff]  ;;  %s2337_s2 = smov [#allocation11]  }
  0x33   :  { %v2393_v2 = vld [vmem:[#allocation3] sm:$0xff]  ;;  %2021 = vmatprep.subr.mxu0 %v81_v0  ;;  %v168_v3 = vld [vmem:[#allocation8 + $0x18] sm:$0xff]  ;;  %v2397_v4 = vld [vmem:[#allocation3 + $0x8] sm:$0xff]  ;;  %s1827_s3 = sshll.u32 %s2337_s2, 4  ;;  %s1828_s3 = int_to_ptr.vmem [resolvable:$true] %s1827_s3 }
  0x34   :  { %2025 = vmatprep.mubr.msk.f32.mxu0 %vm82_vm0, %v2393_v2  ;;  %2022 = vmatpush3.msra.mxu0 %v81_v0  ;;  %v249_v5 = vld [vmem:[#allocation8 + $0x28] sm:$0xff]  ;;  %v167_v6 = vld [vmem:[#allocation8 + $0x10] sm:$0xff]  ;;  %v248_v7 = vld [vmem:[#allocation8 + $0x20] sm:$0xff]  ;;  %s2281_s13 = scalar_lea.vmem %s1828_s3, 2048  ;;  %p2286_p7 = scmp.lt.s32.totalorder %s1828_s3, %s1828_s3 }
  0x35   :  { %2028 = vmatprep.subr.mxu1 %v168_v3  ;;  %2023 = vmatprep.subr.mxu0 %v80_v1  ;;  %v330_v8 = vld [vmem:[#allocation8 + $0x38] sm:$0xff]  ;;  %v411_v9 = vld [vmem:[#allocation8 + $0x48] sm:$0xff]  ;;  %v329_v10 = vld [vmem:[#allocation8 + $0x30] sm:$0xff]  ;;  %p2282_p6 = scmp.ne.s32.totalorder %s1828_s3, %s2281_s13  ;;  %p2287_p8 = scmp.lt.s32.totalorder %s2281_s13, %s2281_s13 }
  0x36   :  { %2029 = vmatpush3.msra.mxu1 %v168_v3  ;;  %2024 = vmatpush3.msra.mxu0 %v80_v1  ;;  %v410_v11 = vld [vmem:[#allocation8 + $0x40] sm:$0xff]  ;;  %v492_v12 = vld [vmem:[#allocation8 + $0x58] sm:$0xff]  ;;  %v491_v13 = vld [vmem:[#allocation8 + $0x50] sm:$0xff] }
  0x37   :  { %2030 = vmatprep.subr.mxu1 %v167_v6  ;;  %2026 = vmatmul.mubr.msk.f32.vlgmr.msra.gmra.mxu0 %vm82_vm0, %v2397_v4  ;;  %v573_v14 = vld [vmem:[#allocation8 + $0x68] sm:$0xff]  ;;  %v572_v15 = vld [vmem:[#allocation8 + $0x60] sm:$0xff]  ;;  %v654_v16 = vld [vmem:[#allocation8 + $0x78] sm:$0xff]  ;;  %p2288_p9 = por %p2287_p8, %p2286_p7 }
  0x38   :  { %2035 = vmatprep.subr.mxu0 %v249_v5  ;;  %2031 = vmatpush3.msra.mxu1 %v167_v6  ;;  %v653_v17 = vld [vmem:[#allocation8 + $0x70] sm:$0xff]  ;;  %v79_v18 = vld [vmem:[#allocation6 + $0x8] sm:$0xff]  ;;  %v959_v20 = vld [vmem:[#allocation9 + $0x8] sm:$0xff] }
  0x39   :  { %2036 = vmatpush3.msra.mxu0 %v249_v5  ;;  %2032 = vmatprep.mubr.msk.f32.mxu1 %vm82_vm0, %v2393_v2  ;;  %v78_v19 = vld [vmem:[#allocation6] sm:$0xff]  ;;  %v958_v46 = vld [vmem:[#allocation9] sm:$0xff]  ;;  %v1039_v49 = vld [vmem:[#allocation9 + $0x18] sm:$0xff]  ;;  %p2289_p10 = pnand %p2288_p9, %p2282_p6 }
  0x3a   :  { %2037 = vmatprep.subr.mxu0 %v248_v7  ;;  %2033 = vmatmul.mubr.msk.f32.vlgmr.msra.gmra.mxu1 %vm82_vm0, %v2397_v4  ;;  %v1038_v55 = vld [vmem:[#allocation9 + $0x10] sm:$0xff]  ;;  %v1119_v56 = vld [vmem:[#allocation9 + $0x28] sm:$0xff]  ;;  %v1118_v57 = vld [vmem:[#allocation9 + $0x20] sm:$0xff] }
  0x3b   :  { %2038 = vmatpush3.msra.mxu0 %v248_v7  ;;  %2039 = vmatprep.mubr.msk.f32.mxu0 %vm82_vm0, %v2393_v2  ;;  %v1199_v58 = vld [vmem:[#allocation9 + $0x38] sm:$0xff]  ;;  %v1198_v59 = vld [vmem:[#allocation9 + $0x30] sm:$0xff]  ;;  %v1279_v60 = vld [vmem:[#allocation9 + $0x48] sm:$0xff] }
  0x3c   :  { %2042 = vmatprep.subr.mxu1 %v330_v8  ;;  %2040 = vmatmul.mubr.msk.f32.vlgmr.msra.gmra.mxu0 %vm82_vm0, %v2397_v4  ;;  %v1278_v61 = vld [vmem:[#allocation9 + $0x40] sm:$0xff]  ;;  %v1359_v62 = vld [vmem:[#allocation9 + $0x58] sm:$0xff]  ;;  %v1358_v63 = vld [vmem:[#allocation9 + $0x50] sm:$0xff] }
  0x3d   :  { %2043 = vmatpush3.msra.mxu1 %v330_v8  ;;  %2049 = vmatprep.subr.mxu0 %v411_v9  ;;  %v1439_v0 = vld [vmem:[#allocation9 + $0x68] sm:$0xff]  ;;  %v1438_v1 = vld [vmem:[#allocation9 + $0x60] sm:$0xff]  ;;  %v1519_v3 = vld [vmem:[#allocation9 + $0x78] sm:$0xff] }
  0x3e   :  { %2044 = vmatprep.subr.mxu1 %v329_v10  ;;  %2050 = vmatpush3.msra.mxu0 %v411_v9  ;;  %v1518_v5 = vld [vmem:[#allocation9 + $0x70] sm:$0xff] }
  0x3f   :  { %2045 = vmatpush3.msra.mxu1 %v329_v10  ;;  %2046 = vmatprep.mubr.msk.f32.mxu1 %vm82_vm0, %v2393_v2 }
  0x40   :  { %2051 = vmatprep.subr.mxu0 %v410_v11  ;;  %2047 = vmatmul.mubr.msk.f32.vlgmr.msra.gmra.mxu1 %vm82_vm0, %v2397_v4 }
  0x41   :  { %2052 = vmatpush3.msra.mxu0 %v410_v11  ;;  %2053 = vmatprep.mubr.msk.f32.mxu0 %vm82_vm0, %v2393_v2 }
  0x42   :  { %2056 = vmatprep.subr.mxu1 %v492_v12  ;;  %2054 = vmatmul.mubr.msk.f32.vlgmr.msra.gmra.mxu0 %vm82_vm0, %v2397_v4 }
  0x43   :  { %2057 = vmatpush3.msra.mxu1 %v492_v12  ;;  %2060 = vmatprep.mubr.msk.f32.mxu1 %vm82_vm0, %v2393_v2 }
  0x44   :  { %2058 = vmatprep.subr.mxu1 %v491_v13  ;;  %2063 = vmatprep.subr.mxu0 %v573_v14 }
  0x45   :  { %2059 = vmatpush3.msra.mxu1 %v491_v13  ;;  %2064 = vmatpush3.msra.mxu0 %v573_v14 }
  0x46   :  { %2061 = vmatmul.mubr.msk.f32.vlgmr.msra.gmra.mxu1 %vm82_vm0, %v2397_v4  ;;  %2065 = vmatprep.subr.mxu0 %v572_v15 }
  0x47   :  { %2067 = vmatprep.mubr.msk.f32.mxu0 %vm82_vm0, %v2393_v2  ;;  %2066 = vmatpush3.msra.mxu0 %v572_v15 }
  0x48   :  { %2070 = vmatprep.subr.mxu1 %v654_v16  ;;  %2068 = vmatmul.mubr.msk.f32.vlgmr.msra.gmra.mxu0 %vm82_vm0, %v2397_v4 }
  0x49   :  { %2071 = vmatpush3.msra.mxu1 %v654_v16  ;;  %2074 = vmatprep.mubr.msk.f32.mxu1 %vm82_vm0, %v2393_v2 }
  0x4a   :  { %2072 = vmatprep.subr.mxu1 %v653_v17  ;;  %2077 = vmatprep.subr.mxu0 %v79_v18 }
  0x4b   :  { %2073 = vmatpush3.msra.mxu1 %v653_v17  ;;  %2078 = vmatpush3.msra.mxu0 %v79_v18 }
  0x4c   :  { %2075 = vmatmul.mubr.msk.f32.vlgmr.msra.gmra.mxu1 %vm82_vm0, %v2397_v4  ;;  %2189 = vmatprep.subr.mxu1 %v79_v18 }
  0x4d   :  { %2191 = vmatpush3.msra.mxu1 %v79_v18  ;;  %2079 = vmatprep.subr.mxu0 %v78_v19 }
  0x4e   :  { %2190 = vmatprep.subr.mxu1 %v78_v19  ;;  %2080 = vmatpush3.msra.mxu0 %v78_v19 }
  0x4f   :  { %2192 = vmatpush3.msra.mxu1 %v78_v19  ;;  %2161 = vmatprep.subr.mxu0 %v79_v18 }
  0x50   :  { %2105 = vmatprep.subr.mxu1 %v959_v20 }
  0xf7   :  { %v2027_v21 = vpop.f32.mrf.mxu0 }
  0xf8   :  { %165 = vst.msk [vmem:[#allocation2 + $0x8] sm:$0xff] %vm82_vm0, %v2027_v21 }
  0xf9   :  { %v155_v22 = vpop.f32.mrf.mxu0 }
  0xfa   :  { %164 = vst.msk [vmem:[#allocation2] sm:$0xff] %vm82_vm0, %v155_v22  ;;  %v2034_v23 = vpop.f32.mrf.mxu1 }
  0xfb   :  { %246 = vst.msk [vmem:[#allocation2 + $0x18] sm:$0xff] %vm82_vm0, %v2034_v23 }
  0xfc   :  { %v2041_v24 = vpop.f32.mrf.mxu0  ;;  %v235_v25 = vpop.f32.mrf.mxu1 }
  0xfd   :  { %327 = vst.msk [vmem:[#allocation2 + $0x28] sm:$0xff] %vm82_vm0, %v2041_v24  ;;  %245 = vst.msk [vmem:[#allocation2 + $0x10] sm:$0xff] %vm82_vm0, %v235_v25 }
  0xfe   :  { %v316_v26 = vpop.f32.mrf.mxu0 }
  0xff   :  { %326 = vst.msk [vmem:[#allocation2 + $0x20] sm:$0xff] %vm82_vm0, %v316_v26  ;;  %v734_v31 = vld [vmem:[#allocation2 + $0x8] sm:$0xff] }
 0x100   :  { %v2048_v27 = vpop.f32.mrf.mxu1 }
 0x101   :  { %408 = vst.msk [vmem:[#allocation2 + $0x38] sm:$0xff] %vm82_vm0, %v2048_v27  ;;  %v733_v28 = vld [vmem:[#allocation2] sm:$0xff] }
 0x102   :  { %v2055_v29 = vpop.f32.mrf.mxu0  ;;  %v397_v30 = vpop.f32.mrf.mxu1  ;;  %2081 = vmatprep.mubr.msk.f32.mxu0 %vm82_vm0, %v733_v28  ;;  %v736_v35 = vld [vmem:[#allocation2 + $0x18] sm:$0xff] }
 0x103   :  { %489 = vst.msk [vmem:[#allocation2 + $0x48] sm:$0xff] %vm82_vm0, %v2055_v29  ;;  %407 = vst.msk [vmem:[#allocation2 + $0x30] sm:$0xff] %vm82_vm0, %v397_v30  ;;  %2082 = vmatmul.mubr.msk.f32.vlgmr.msra.gmra.mxu0 %vm82_vm0, %v734_v31 }
 0x104   :  { %v478_v32 = vpop.f32.mrf.mxu0  ;;  %v735_v33 = vld [vmem:[#allocation2 + $0x10] sm:$0xff]  ;;  %2162 = vmatpush3.msra.mxu0 %v79_v18  ;;  %v738_v40 = vld [vmem:[#allocation2 + $0x28] sm:$0xff] }
 0x105   :  { %488 = vst.msk [vmem:[#allocation2 + $0x40] sm:$0xff] %vm82_vm0, %v478_v32  ;;  %2084 = vmatprep.mubr.msk.f32.mxu0 %vm82_vm0, %v735_v33  ;;  %2163 = vmatprep.subr.mxu0 %v78_v19 }
 0x106   :  { %v2062_v34 = vpop.f32.mrf.mxu1  ;;  %2164 = vmatpush3.msra.mxu0 %v78_v19  ;;  %v737_v37 = vld [vmem:[#allocation2 + $0x20] sm:$0xff] }
 0x107   :  { %570 = vst.msk [vmem:[#allocation2 + $0x58] sm:$0xff] %vm82_vm0, %v2062_v34  ;;  %2085 = vmatmul.mubr.msk.f32.gmra.mxu0 %vm82_vm0, %v736_v35 }
 0x108   :  { %v559_v36 = vpop.f32.mrf.mxu1  ;;  %v2069_v38 = vpop.f32.mrf.mxu0  ;;  %2087 = vmatprep.mubr.msk.f32.mxu0 %vm82_vm0, %v737_v37  ;;  %v740_v47 = vld [vmem:[#allocation2 + $0x38] sm:$0xff] }
 0x109   :  { %569 = vst.msk [vmem:[#allocation2 + $0x50] sm:$0xff] %vm82_vm0, %v559_v36  ;;  %651 = vst.msk [vmem:[#allocation2 + $0x68] sm:$0xff] %vm82_vm0, %v2069_v38 }
 0x10a   :  { %v640_v39 = vpop.f32.mrf.mxu0  ;;  %v739_v42 = vld [vmem:[#allocation2 + $0x30] sm:$0xff]  ;;  %v742_v44 = vld [vmem:[#allocation2 + $0x48] sm:$0xff] }
 0x10b   :  { %650 = vst.msk [vmem:[#allocation2 + $0x60] sm:$0xff] %vm82_vm0, %v640_v39  ;;  %2088 = vmatmul.mubr.msk.f32.gmra.mxu0 %vm82_vm0, %v738_v40 }
 0x10c   :  { %v2076_v41 = vpop.f32.mrf.mxu1  ;;  %v741_v43 = vld [vmem:[#allocation2 + $0x40] sm:$0xff]  ;;  %2090 = vmatprep.mubr.msk.f32.mxu0 %vm82_vm0, %v739_v42 }
 0x10d   :  { %732 = vst.msk [vmem:[#allocation2 + $0x78] sm:$0xff] %vm82_vm0, %v2076_v41  ;;  %2093 = vmatprep.mubr.msk.f32.mxu1 %vm82_vm0, %v741_v43 }
 0x10e   :  { %v721_v45 = vpop.f32.mrf.mxu1  ;;  %2094 = vmatmul.mubr.msk.f32.vlgmr.msra.gmra.mxu1 %vm82_vm0, %v742_v44  ;;  %v744_v50 = vld [vmem:[#allocation2 + $0x58] sm:$0xff] }
 0x10f   :  { %731 = vst.msk [vmem:[#allocation2 + $0x70] sm:$0xff] %vm82_vm0, %v721_v45  ;;  %2106 = vmatpush3.msra.mxu1 %v959_v20  ;;  %2091 = vmatmul.mubr.msk.f32.gmra.mxu0 %vm82_vm0, %v740_v47 }
 0x110   :  { %v743_v48 = vld [vmem:[#allocation2 + $0x50] sm:$0xff]  ;;  %2107 = vmatprep.subr.mxu1 %v958_v46  ;;  %v746_v52 = vld [vmem:[#allocation2 + $0x68] sm:$0xff] }
 0x111   :  { %2096 = vmatprep.mubr.msk.f32.mxu1 %vm82_vm0, %v743_v48  ;;  %2108 = vmatpush3.msra.mxu1 %v958_v46 }
 0x112   :  { %2097 = vmatmul.mubr.msk.f32.gmra.mxu1 %vm82_vm0, %v744_v50  ;;  %v745_v51 = vld [vmem:[#allocation2 + $0x60] sm:$0xff]  ;;  %2112 = vmatprep.subr.mxu1 %v1039_v49 }
 0x113   :  { %2099 = vmatprep.mubr.msk.f32.mxu1 %vm82_vm0, %v745_v51 }
 0x114   :  { %v748_v54 = vld [vmem:[#allocation2 + $0x78] sm:$0xff] }
 0x116   :  { %v747_v53 = vld [vmem:[#allocation2 + $0x70] sm:$0xff]  ;;  %2100 = vmatmul.mubr.msk.f32.gmra.mxu1 %vm82_vm0, %v746_v52 }
 0x117   :  { %2102 = vmatprep.mubr.msk.f32.mxu1 %vm82_vm0, %v747_v53 }
 0x11a   :  { %2103 = vmatmul.mubr.msk.f32.gmra.mxu1 %vm82_vm0, %v748_v54 }
 0x11b   :  { %2109 = vmatprep.mubr.msk.f32.mxu1 %vm82_vm0, %v2393_v2 }
 0x11e   :  { %2110 = vmatmul.mubr.msk.f32.vlgmr.msra.gmra.mxu1 %vm82_vm0, %v2397_v4 }
 0x11f   :  { %2113 = vmatpush3.msra.mxu1 %v1039_v49  ;;  %2116 = vmatprep.mubr.msk.f32.mxu1 %vm82_vm0, %v2393_v2 }
 0x120   :  { %2114 = vmatprep.subr.mxu1 %v1038_v55 }
 0x121   :  { %2115 = vmatpush3.msra.mxu1 %v1038_v55 }
 0x122   :  { %2117 = vmatmul.mubr.msk.f32.vlgmr.msra.gmra.mxu1 %vm82_vm0, %v2397_v4  ;;  %2119 = vmatprep.subr.mxu1 %v1119_v56 }
 0x123   :  { %2120 = vmatpush3.msra.mxu1 %v1119_v56  ;;  %2123 = vmatprep.mubr.msk.f32.mxu1 %vm82_vm0, %v2393_v2 }
 0x124   :  { %2121 = vmatprep.subr.mxu1 %v1118_v57 }
 0x125   :  { %2122 = vmatpush3.msra.mxu1 %v1118_v57 }
 0x126   :  { %2124 = vmatmul.mubr.msk.f32.vlgmr.msra.gmra.mxu1 %vm82_vm0, %v2397_v4  ;;  %2126 = vmatprep.subr.mxu1 %v1199_v58 }
 0x127   :  { %2127 = vmatpush3.msra.mxu1 %v1199_v58  ;;  %2130 = vmatprep.mubr.msk.f32.mxu1 %vm82_vm0, %v2393_v2 }
 0x128   :  { %2128 = vmatprep.subr.mxu1 %v1198_v59 }
 0x129   :  { %2129 = vmatpush3.msra.mxu1 %v1198_v59 }
 0x12a   :  { %2131 = vmatmul.mubr.msk.f32.vlgmr.msra.gmra.mxu1 %vm82_vm0, %v2397_v4  ;;  %2133 = vmatprep.subr.mxu1 %v1279_v60 }
 0x12b   :  { %2134 = vmatpush3.msra.mxu1 %v1279_v60  ;;  %2137 = vmatprep.mubr.msk.f32.mxu1 %vm82_vm0, %v2393_v2 }
 0x12c   :  { %2135 = vmatprep.subr.mxu1 %v1278_v61 }
 0x12d   :  { %2136 = vmatpush3.msra.mxu1 %v1278_v61 }
 0x12e   :  { %2138 = vmatmul.mubr.msk.f32.vlgmr.msra.gmra.mxu1 %vm82_vm0, %v2397_v4  ;;  %2140 = vmatprep.subr.mxu1 %v1359_v62 }
 0x12f   :  { %2141 = vmatpush3.msra.mxu1 %v1359_v62  ;;  %2144 = vmatprep.mubr.msk.f32.mxu1 %vm82_vm0, %v2393_v2 }
 0x130   :  { %2142 = vmatprep.subr.mxu1 %v1358_v63 }
 0x131   :  { %2143 = vmatpush3.msra.mxu1 %v1358_v63 }
 0x132   :  { %2145 = vmatmul.mubr.msk.f32.vlgmr.msra.gmra.mxu1 %vm82_vm0, %v2397_v4  ;;  %2147 = vmatprep.subr.mxu1 %v1439_v0 }
 0x133   :  { %2148 = vmatpush3.msra.mxu1 %v1439_v0  ;;  %2151 = vmatprep.mubr.msk.f32.mxu1 %vm82_vm0, %v2393_v2 }
 0x134   :  { %2149 = vmatprep.subr.mxu1 %v1438_v1 }
 0x135   :  { %2150 = vmatpush3.msra.mxu1 %v1438_v1 }
 0x136   :  { %2152 = vmatmul.mubr.msk.f32.vlgmr.msra.gmra.mxu1 %vm82_vm0, %v2397_v4  ;;  %2154 = vmatprep.subr.mxu1 %v1519_v3 }
 0x137   :  { %2155 = vmatpush3.msra.mxu1 %v1519_v3  ;;  %2158 = vmatprep.mubr.msk.f32.mxu1 %vm82_vm0, %v2393_v2 }
 0x138   :  { %2156 = vmatprep.subr.mxu1 %v1518_v5 }
 0x139   :  { %2157 = vmatpush3.msra.mxu1 %v1518_v5 }
 0x13a   :  { %2159 = vmatmul.mubr.msk.f32.vlgmr.msra.gmra.mxu1 %vm82_vm0, %v2397_v4 }
 0x1c3   :  { %v2083_v6 = vpop.f32.mrf.mxu0 }
 0x1c4   :  { %943 = vst.msk [vmem:[#allocation11 + $0x8] sm:$0xff] %vm82_vm0, %v2083_v6 }
 0x1c5   :  { %v863_v7 = vpop.f32.mrf.mxu0 }
 0x1c6   :  { %942 = vst.msk [vmem:[#allocation11] sm:$0xff] %vm82_vm0, %v863_v7 }
 0x1c7   :  { %v2086_v8 = vpop.f32.mrf.mxu0 }
 0x1c8   :  { %945 = vst.msk [vmem:[#allocation11 + $0x18] sm:$0xff] %vm82_vm0, %v2086_v8 }
 0x1c9   :  { %v873_v9 = vpop.f32.mrf.mxu0 }
 0x1ca   :  { %944 = vst.msk [vmem:[#allocation11 + $0x10] sm:$0xff] %vm82_vm0, %v873_v9 }
 0x1cb   :  { %v2089_v10 = vpop.f32.mrf.mxu0 }
 0x1cc   :  { %947 = vst.msk [vmem:[#allocation11 + $0x28] sm:$0xff] %vm82_vm0, %v2089_v10 }
 0x1cd   :  { %v883_v2 = vpop.f32.mrf.mxu0 }
 0x1ce   :  { %v2095_v11 = vpop.f32.mrf.mxu1  ;;  %946 = vst.msk [vmem:[#allocation11 + $0x20] sm:$0xff] %vm82_vm0, %v883_v2 }
 0x1cf   :  { %951 = vst.msk [vmem:[#allocation11 + $0x48] sm:$0xff] %vm82_vm0, %v2095_v11  ;;  %v2092_v4 = vpop.f32.mrf.mxu0 }
 0x1d0   :  { %v903_v12 = vpop.f32.mrf.mxu1  ;;  %949 = vst.msk [vmem:[#allocation11 + $0x38] sm:$0xff] %vm82_vm0, %v2092_v4 }
 0x1d1   :  { %950 = vst.msk [vmem:[#allocation11 + $0x40] sm:$0xff] %vm82_vm0, %v903_v12  ;;  %v893_v13 = vpop.f32.mrf.mxu0 }
 0x1d2   :  { %v2098_v14 = vpop.f32.mrf.mxu1  ;;  %948 = vst.msk [vmem:[#allocation11 + $0x30] sm:$0xff] %vm82_vm0, %v893_v13 }
 0x1d3   :  { %953 = vst.msk [vmem:[#allocation11 + $0x58] sm:$0xff] %vm82_vm0, %v2098_v14 }
 0x1d4   :  { %v913_v15 = vpop.f32.mrf.mxu1 }
 0x1d5   :  { %952 = vst.msk [vmem:[#allocation11 + $0x50] sm:$0xff] %vm82_vm0, %v913_v15 }
 0x1d6   :  { %v2101_v16 = vpop.f32.mrf.mxu1 }
 0x1d7   :  { %955 = vst.msk [vmem:[#allocation11 + $0x68] sm:$0xff] %vm82_vm0, %v2101_v16 }
 0x1d8   :  { %v923_v17 = vpop.f32.mrf.mxu1 }
 0x1d9   :  { %954 = vst.msk [vmem:[#allocation11 + $0x60] sm:$0xff] %vm82_vm0, %v923_v17 }
 0x1da   :  { %v2104_v18 = vpop.f32.mrf.mxu1 }
 0x1db   :  { %957 = vst.msk [vmem:[#allocation11 + $0x78] sm:$0xff] %vm82_vm0, %v2104_v18 }
 0x1dc   :  { %v933_v19 = vpop.f32.mrf.mxu1 }
 0x1dd   :  { %956 = vst.msk [vmem:[#allocation11 + $0x70] sm:$0xff] %vm82_vm0, %v933_v19 }
 0x1de   :  { %v2111_v20 = vpop.f32.mrf.mxu1 }
 0x1df   :  { %1036 = vst.msk [vmem:[#allocation2 + $0x8] sm:$0xff] %vm82_vm0, %v2111_v20 }
 0x1e0   :  { %v1026_v21 = vpop.f32.mrf.mxu1 }
 0x1e1   :  { %1035 = vst.msk [vmem:[#allocation2] sm:$0xff] %vm82_vm0, %v1026_v21 }
 0x1e2   :  { %v2118_v22 = vpop.f32.mrf.mxu1 }
 0x1e3   :  { %1116 = vst.msk [vmem:[#allocation2 + $0x18] sm:$0xff] %vm82_vm0, %v2118_v22 }
 0x1e4   :  { %v1106_v23 = vpop.f32.mrf.mxu1 }
 0x1e5   :  { %1115 = vst.msk [vmem:[#allocation2 + $0x10] sm:$0xff] %vm82_vm0, %v1106_v23 }
 0x1e6   :  { %v2125_v24 = vpop.f32.mrf.mxu1  ;;  %v1598_v27 = vld [vmem:[#allocation2 + $0x8] sm:$0xff] }
 0x1e7   :  { %1196 = vst.msk [vmem:[#allocation2 + $0x28] sm:$0xff] %vm82_vm0, %v2125_v24 }
 0x1e8   :  { %v1186_v25 = vpop.f32.mrf.mxu1  ;;  %v1597_v26 = vld [vmem:[#allocation2] sm:$0xff] }
 0x1e9   :  { %1195 = vst.msk [vmem:[#allocation2 + $0x20] sm:$0xff] %vm82_vm0, %v1186_v25  ;;  %2165 = vmatprep.mubr.msk.f32.mxu0 %vm82_vm0, %v1597_v26 }
 0x1ea   :  { %v2132_v28 = vpop.f32.mrf.mxu1  ;;  %2166 = vmatmul.mubr.msk.f32.vlgmr.msra.gmra.mxu0 %vm82_vm0, %v1598_v27  ;;  %v1600_v31 = vld [vmem:[#allocation2 + $0x18] sm:$0xff] }
 0x1eb   :  { %1276 = vst.msk [vmem:[#allocation2 + $0x38] sm:$0xff] %vm82_vm0, %v2132_v28 }
 0x1ec   :  { %v1266_v29 = vpop.f32.mrf.mxu1  ;;  %v1599_v30 = vld [vmem:[#allocation2 + $0x10] sm:$0xff] }
 0x1ed   :  { %1275 = vst.msk [vmem:[#allocation2 + $0x30] sm:$0xff] %vm82_vm0, %v1266_v29  ;;  %2168 = vmatprep.mubr.msk.f32.mxu0 %vm82_vm0, %v1599_v30 }
 0x1ee   :  { %v2139_v32 = vpop.f32.mrf.mxu1  ;;  %2169 = vmatmul.mubr.msk.f32.gmra.mxu0 %vm82_vm0, %v1600_v31  ;;  %v1602_v35 = vld [vmem:[#allocation2 + $0x28] sm:$0xff] }
 0x1ef   :  { %1356 = vst.msk [vmem:[#allocation2 + $0x48] sm:$0xff] %vm82_vm0, %v2139_v32 }
 0x1f0   :  { %v1346_v33 = vpop.f32.mrf.mxu1  ;;  %v1601_v34 = vld [vmem:[#allocation2 + $0x20] sm:$0xff] }
 0x1f1   :  { %1355 = vst.msk [vmem:[#allocation2 + $0x40] sm:$0xff] %vm82_vm0, %v1346_v33  ;;  %2171 = vmatprep.mubr.msk.f32.mxu0 %vm82_vm0, %v1601_v34 }
 0x1f2   :  { %v2146_v36 = vpop.f32.mrf.mxu1  ;;  %2172 = vmatmul.mubr.msk.f32.gmra.mxu0 %vm82_vm0, %v1602_v35  ;;  %v1604_v39 = vld [vmem:[#allocation2 + $0x38] sm:$0xff] }
 0x1f3   :  { %1436 = vst.msk [vmem:[#allocation2 + $0x58] sm:$0xff] %vm82_vm0, %v2146_v36 }
 0x1f4   :  { %v1426_v37 = vpop.f32.mrf.mxu1  ;;  %v1603_v38 = vld [vmem:[#allocation2 + $0x30] sm:$0xff] }
 0x1f5   :  { %1435 = vst.msk [vmem:[#allocation2 + $0x50] sm:$0xff] %vm82_vm0, %v1426_v37  ;;  %2174 = vmatprep.mubr.msk.f32.mxu0 %vm82_vm0, %v1603_v38 }
 0x1f6   :  { %v2153_v40 = vpop.f32.mrf.mxu1  ;;  %2175 = vmatmul.mubr.msk.f32.gmra.mxu0 %vm82_vm0, %v1604_v39  ;;  %v1606_v43 = vld [vmem:[#allocation2 + $0x48] sm:$0xff] }
 0x1f7   :  { %1516 = vst.msk [vmem:[#allocation2 + $0x68] sm:$0xff] %vm82_vm0, %v2153_v40 }
 0x1f8   :  { %v1506_v41 = vpop.f32.mrf.mxu1  ;;  %v1605_v42 = vld [vmem:[#allocation2 + $0x40] sm:$0xff] }
 0x1f9   :  { %1515 = vst.msk [vmem:[#allocation2 + $0x60] sm:$0xff] %vm82_vm0, %v1506_v41  ;;  %2177 = vmatprep.mubr.msk.f32.mxu0 %vm82_vm0, %v1605_v42 }
 0x1fa   :  { %v2160_v44 = vpop.f32.mrf.mxu1  ;;  %2178 = vmatmul.mubr.msk.f32.gmra.mxu0 %vm82_vm0, %v1606_v43  ;;  %v1608_v47 = vld [vmem:[#allocation2 + $0x58] sm:$0xff] }
 0x1fb   :  { %1596 = vst.msk [vmem:[#allocation2 + $0x78] sm:$0xff] %vm82_vm0, %v2160_v44 }
 0x1fc   :  { %v1586_v45 = vpop.f32.mrf.mxu1  ;;  %v1607_v46 = vld [vmem:[#allocation2 + $0x50] sm:$0xff] }
 0x1fd   :  { %1595 = vst.msk [vmem:[#allocation2 + $0x70] sm:$0xff] %vm82_vm0, %v1586_v45  ;;  %2180 = vmatprep.mubr.msk.f32.mxu0 %vm82_vm0, %v1607_v46 }
 0x1fe   :  { %2181 = vmatmul.mubr.msk.f32.gmra.mxu0 %vm82_vm0, %v1608_v47  ;;  %v1610_v49 = vld [vmem:[#allocation2 + $0x68] sm:$0xff] }
 0x200   :  { %v1609_v48 = vld [vmem:[#allocation2 + $0x60] sm:$0xff] }
 0x201   :  { %2183 = vmatprep.mubr.msk.f32.mxu0 %vm82_vm0, %v1609_v48 }
 0x202   :  { %2184 = vmatmul.mubr.msk.f32.gmra.mxu0 %vm82_vm0, %v1610_v49  ;;  %v1612_v51 = vld [vmem:[#allocation2 + $0x78] sm:$0xff] }
 0x204   :  { %v1611_v50 = vld [vmem:[#allocation2 + $0x70] sm:$0xff] }
 0x205   :  { %2186 = vmatprep.mubr.msk.f32.mxu0 %vm82_vm0, %v1611_v50 }
 0x206   :  { %2187 = vmatmul.mubr.msk.f32.gmra.mxu0 %vm82_vm0, %v1612_v51 }
 0x207   :  { %2292 = shalt.err (!%p2289_p10)
}
 0x208   :  { %1833 = dma.vmem_to_hbm [thread:$0]  %s1828_s3, 2048, %s2573_s4, [#allocation5], %s2333_s23, %s2333_s23, %s2334_s24  }
 0x209   :  { %s2338_s4 = smov [#allocation12]  }
 0x20a   :  { %s1839_s16 = sshll.u32 %s2338_s4, 4  ;;  %s1840_s16 = int_to_ptr.vmem [resolvable:$true] %s1839_s16 }
 0x20b   :  { %s2301_s17 = scalar_lea.vmem %s1840_s16, 2048  ;;  %p2306_p12 = scmp.lt.s32.totalorder %s1840_s16, %s1840_s16 }
 0x20c   :  { %p2302_p11 = scmp.ne.s32.totalorder %s1840_s16, %s2301_s17  ;;  %p2307_p13 = scmp.lt.s32.totalorder %s2301_s17, %s2301_s17 }
 0x20e   :  { %p2308_p0 = por %p2307_p13, %p2306_p12 }
 0x210   :  { %p2309_p1 = pnand %p2308_p0, %p2302_p11 }
 0x2aa   :  { %v2167_v52 = vpop.f32.mrf.mxu0 }
 0x2ab   :  { %1807 = vst.msk [vmem:[#allocation12 + $0x8] sm:$0xff] %vm82_vm0, %v2167_v52 }
 0x2ac   :  { %v1727_v53 = vpop.f32.mrf.mxu0 }
 0x2ad   :  { %1806 = vst.msk [vmem:[#allocation12] sm:$0xff] %vm82_vm0, %v1727_v53 }
 0x2ae   :  { %v2170_v54 = vpop.f32.mrf.mxu0 }
 0x2af   :  { %1809 = vst.msk [vmem:[#allocation12 + $0x18] sm:$0xff] %vm82_vm0, %v2170_v54 }
 0x2b0   :  { %v1737_v55 = vpop.f32.mrf.mxu0 }
 0x2b1   :  { %1808 = vst.msk [vmem:[#allocation12 + $0x10] sm:$0xff] %vm82_vm0, %v1737_v55 }
 0x2b2   :  { %v2173_v56 = vpop.f32.mrf.mxu0 }
 0x2b3   :  { %1811 = vst.msk [vmem:[#allocation12 + $0x28] sm:$0xff] %vm82_vm0, %v2173_v56 }
 0x2b4   :  { %v1747_v57 = vpop.f32.mrf.mxu0 }
 0x2b5   :  { %1810 = vst.msk [vmem:[#allocation12 + $0x20] sm:$0xff] %vm82_vm0, %v1747_v57 }
 0x2b6   :  { %v2176_v58 = vpop.f32.mrf.mxu0 }
 0x2b7   :  { %1813 = vst.msk [vmem:[#allocation12 + $0x38] sm:$0xff] %vm82_vm0, %v2176_v58 }
 0x2b8   :  { %v1757_v59 = vpop.f32.mrf.mxu0 }
 0x2b9   :  { %1812 = vst.msk [vmem:[#allocation12 + $0x30] sm:$0xff] %vm82_vm0, %v1757_v59 }
 0x2ba   :  { %v2179_v60 = vpop.f32.mrf.mxu0 }
 0x2bb   :  { %1815 = vst.msk [vmem:[#allocation12 + $0x48] sm:$0xff] %vm82_vm0, %v2179_v60 }
 0x2bc   :  { %v1767_v61 = vpop.f32.mrf.mxu0 }
 0x2bd   :  { %1814 = vst.msk [vmem:[#allocation12 + $0x40] sm:$0xff] %vm82_vm0, %v1767_v61 }
 0x2be   :  { %v2182_v62 = vpop.f32.mrf.mxu0 }
 0x2bf   :  { %1817 = vst.msk [vmem:[#allocation12 + $0x58] sm:$0xff] %vm82_vm0, %v2182_v62 }
 0x2c0   :  { %v1777_v63 = vpop.f32.mrf.mxu0 }
 0x2c1   :  { %1816 = vst.msk [vmem:[#allocation12 + $0x50] sm:$0xff] %vm82_vm0, %v1777_v63 }
 0x2c2   :  { %v2185_v0 = vpop.f32.mrf.mxu0 }
 0x2c3   :  { %1819 = vst.msk [vmem:[#allocation12 + $0x68] sm:$0xff] %vm82_vm0, %v2185_v0 }
 0x2c4   :  { %v1787_v1 = vpop.f32.mrf.mxu0 }
 0x2c5   :  { %1818 = vst.msk [vmem:[#allocation12 + $0x60] sm:$0xff] %vm82_vm0, %v1787_v1 }
 0x2c6   :  { %v2188_v3 = vpop.f32.mrf.mxu0 }
 0x2c7   :  { %1821 = vst.msk [vmem:[#allocation12 + $0x78] sm:$0xff] %vm82_vm0, %v2188_v3 }
 0x2c8   :  { %v1797_v5 = vpop.f32.mrf.mxu0 }
 0x2c9   :  { %1820 = vst.msk [vmem:[#allocation12 + $0x70] sm:$0xff] %vm82_vm0, %v1797_v5 }
 0x2ca   :  { %2312 = shalt.err (!%p2309_p1)
}
 0x2cb   :  { %1845 = dma.vmem_to_hbm [thread:$0]  %s1840_s16, 2048, %s2574_s5, [#allocation13], %s2333_s23, %s2333_s23, %s2334_s24  }
 0x2cc   :  { %2327 = dma.done.wait [#allocation5], 2048  }
 0x2cd   :  { %2328 = vsyncadd [#allocation5], 4294965248 }
 0x2ce   :  { %2329 = dma.done.wait [#allocation13], 2048  }
 0x2cf   :  { %2330 = vsyncadd [#allocation13], 4294965248 }
 0x2d0   :  { %1852 = vsyncpa [#allocation4], 1 }
 0x2d1   :  { %1853 = vsyncpa [#allocation7], 1 }
 0x2d2   :  { %1854 = vsyncpa [#allocation10], 1 }
 0x2d3   :  { %1855 = vsyncpa [#allocation5], 1 }
 0x2d4   :  { %1856 = vsyncpa [#allocation13], 1 }

</bundles_post_ra>
